<compile_context>
chip_gen: v6e
topology: v6e:2x2x1
jax: 0.10.0
libtpu: 0.0.40
codegen_flags: <defaults>
</compile_context>

<pallas_src>
import functools

import jax
import jax.numpy as jnp
from jax.experimental import pallas as pl
from jax.experimental.pallas import tpu as pltpu


def _round_up(x, m):
    return (x + m - 1) // m * m


def _leaky_relu(x, slope=0.01):
    # For 0 < slope < 1, max(x, slope*x) == leaky_relu(x).
    return jnp.maximum(x, slope * x)


def _layernorm_padded(h, gamma, beta, n_real, n_total, eps=1e-5):
    """LayerNorm over a zero-padded last dim (padded lanes of `h` are exactly zero).

    Two-pass: mean over full padded width equals the real-feature mean (padded lanes
    are zero, divisor is n_real).  The centered sum of squares over the padded width
    over-counts by (n_total - n_real) * mu^2, which is subtracted analytically.
    gamma/beta padded lanes are zero, so the output's padded lanes remain exactly zero.
    """
    inv_n = 1.0 / float(n_real)
    mu = jnp.sum(h, axis=-1, keepdims=True) * inv_n
    d = h - mu
    extra = float(n_total - n_real)
    var = (jnp.sum(d * d, axis=-1, keepdims=True) - extra * (mu * mu)) * inv_n
    var = jnp.maximum(var, 0.0)
    return d * jax.lax.rsqrt(var + eps) * gamma + beta


# ----------------------------------------------------------------------------
# Kernel
# ----------------------------------------------------------------------------
def _critic_kernel(x_ref, u_ref, w1_ref, w2_ref, p_ref, out_ref, *,
                   layer_norm, d_in, d_in_pad, h1_dim, h1_pad, h2_dim, h2_pad):
    tb = x_ref.shape[0]
    p = p_ref[...]                                  # (8, pw) packed small params (f32)

    b1, g1, be1 = p[0:1, :h1_pad], p[1:2, :h1_pad], p[2:3, :h1_pad]
    b2, g2, be2 = p[3:4, :h2_pad], p[4:5, :h2_pad], p[5:6, :h2_pad]
    b3 = p[6:7, 0:1]                                # (1, 1)
    w3_row = p[7:8, :h2_pad]                        # (1, h2_pad), f32

    # ---- in-kernel concat + zero lane-pad to 128 (no host concat/pad HBM pass) ----
    parts = [x_ref[...], u_ref[...]]
    if d_in_pad > d_in:
        parts.append(jnp.zeros((tb, d_in_pad - d_in), jnp.float32))
    xu = jnp.concatenate(parts, axis=-1)            # (tb, d_in_pad), f32, padded lanes 0

    # ---- layer 1: Linear(d_in, 400) [+ LayerNorm] + leaky_relu ----
    h1 = jnp.dot(xu.astype(jnp.bfloat16), w1_ref[...],
                 preferred_element_type=jnp.float32) + b1
    if layer_norm:
        h1 = _layernorm_padded(h1, g1, be1, h1_dim, h1_pad)
    h1 = _leaky_relu(h1)

    # ---- layer 2: Linear(400, 300) [+ LayerNorm] + leaky_relu ----
    h2 = jnp.dot(h1.astype(jnp.bfloat16), w2_ref[...],
                 preferred_element_type=jnp.float32) + b2
    if layer_norm:
        h2 = _layernorm_padded(h2, g2, be2, h2_dim, h2_pad)
    h2 = _leaky_relu(h2)

    # ---- layer 3: Linear(300, 1) as a VPU multiply + lane reduce (single column) ----
    out_ref[...] = jnp.sum(h2 * w3_row, axis=-1, keepdims=True) + b3


# ----------------------------------------------------------------------------
# Host-side packing / wrapper
# ----------------------------------------------------------------------------
def _pack_params(p, d_in, d_in_pad, h1_pad, h2_pad, pw):
    h1 = p["w1"].shape[1]
    h2 = p["w2"].shape[1]

    # Weights: zero-pad then narrow to bf16 for the MXU.  Padded columns stay exact
    # zeros, which the padded-width LayerNorm relies on.
    w1p = (jnp.zeros((d_in_pad, h1_pad), jnp.float32)
           .at[:d_in, :h1].set(p["w1"]).astype(jnp.bfloat16))
    w2p = (jnp.zeros((h1_pad, h2_pad), jnp.float32)
           .at[:h1, :h2].set(p["w2"]).astype(jnp.bfloat16))

    # Small params packed into one (8, pw) f32 block: b1,g1,be1,b2,g2,be2,b3,w3_row.
    pvec = jnp.zeros((8, pw), jnp.float32)
    pvec = pvec.at[0, :h1].set(p["b1"].reshape(-1))
    pvec = pvec.at[1, :h1].set(p["g1"].reshape(-1))
    pvec = pvec.at[2, :h1].set(p["be1"].reshape(-1))
    pvec = pvec.at[3, :h2].set(p["b2"].reshape(-1))
    pvec = pvec.at[4, :h2].set(p["g2"].reshape(-1))
    pvec = pvec.at[5, :h2].set(p["be2"].reshape(-1))
    pvec = pvec.at[6, 0].set(p["b3"].reshape(-1)[0])
    pvec = pvec.at[7, :h2].set(p["w3"][:, 0])
    return w1p, w2p, pvec


def _choose_batch_tile(batch):
    """>=2 parallel grid steps when possible (v7x dual TC), small tail waste, cap 512."""
    if batch <= 16:
        return 16
    half = -(-batch // 2)                       # cdiv(batch, 2)
    return min(512, _round_up(half, 16))        # multiple of 16 sublanes (bf16-friendly)


def pourchot_critic_forward(x, u, params, *, layer_norm=True):
    """Q(x, u) for the full batch in one Pallas call (batch tiled on a parallel grid)."""
    batch, state_dim = x.shape
    action_dim = u.shape[1]
    d_in = state_dim + action_dim
    h1_dim = params["w1"].shape[1]              # 400
    h2_dim = params["w2"].shape[1]              # 300

    d_in_pad = _round_up(d_in, 128)
    h1_pad = _round_up(h1_dim, 128)             # 512
    h2_pad = _round_up(h2_dim, 128)             # 384
    pw = max(h1_pad, h2_pad, 128)

    w1p, w2p, pvec = _pack_params(params, d_in, d_in_pad, h1_pad, h2_pad, pw)

    tb = _choose_batch_tile(batch)
    batch_pad = _round_up(batch, tb)
    if batch_pad != batch:
        x = jnp.pad(x, ((0, batch_pad - batch), (0, 0)))
        u = jnp.pad(u, ((0, batch_pad - batch), (0, 0)))

    kernel = functools.partial(
        _critic_kernel,
        layer_norm=layer_norm,
        d_in=d_in, d_in_pad=d_in_pad,
        h1_dim=h1_dim, h1_pad=h1_pad,
        h2_dim=h2_dim, h2_pad=h2_pad,
    )

    out = pl.pallas_call(
        kernel,
        out_shape=jax.ShapeDtypeStruct((batch_pad, 1), jnp.float32),
        grid_spec=pltpu.PrefetchScalarGridSpec(
            num_scalar_prefetch=0,
            grid=(batch_pad // tb,),
            in_specs=[
                pl.BlockSpec((tb, state_dim), lambda i: (i, 0)),      # x (streamed)
                pl.BlockSpec((tb, action_dim), lambda i: (i, 0)),     # u (streamed)
                pl.BlockSpec((d_in_pad, h1_pad), lambda i: (0, 0)),   # W1 bf16 (resident)
                pl.BlockSpec((h1_pad, h2_pad), lambda i: (0, 0)),     # W2 bf16 (resident)
                pl.BlockSpec((8, pw), lambda i: (0, 0)),              # packed small params
            ],
            out_specs=pl.BlockSpec((tb, 1), lambda i: (i, 0)),
        ),
        compiler_params=pltpu.CompilerParams(
            dimension_semantics=("parallel",),
        ),
    )(x, u, w1p, w2p, pvec)

    return out[:batch]


# ----------------------------------------------------------------------------
# Params + pure-JAX reference (PyTorch semantics)
# ----------------------------------------------------------------------------
def init_params(key, state_dim, action_dim):
    """PyTorch nn.Linear-style init: U(-1/sqrt(fan_in), 1/sqrt(fan_in))."""
    def linear(k, fan_in, fan_out):
        kw, kb = jax.random.split(k)
        bound = 1.0 / jnp.sqrt(fan_in)
        w = jax.random.uniform(kw, (fan_in, fan_out), jnp.float32, -bound, bound)
        b = jax.random.uniform(kb, (fan_out,), jnp.float32, -bound, bound)
        return w, b

    k1, k2, k3 = jax.random.split(key, 3)
    d_in = state_dim + action_dim
    w1, b1 = linear(k1, d_in, 400)
    w2, b2 = linear(k2, 400, 300)
    w3, b3 = linear(k3, 300, 1)
    return {
        "w1": w1, "b1": b1,
        "g1": jnp.ones((400,), jnp.float32), "be1": jnp.zeros((400,), jnp.float32),
        "w2": w2, "b2": b2,
        "g2": jnp.ones((300,), jnp.float32), "be2": jnp.zeros((300,), jnp.float32),
        "w3": w3, "b3": b3,
    }


def _ln_ref(h, gamma, beta, eps=1e-5):
    # PyTorch LayerNorm: biased variance, eps=1e-5, two-pass.
    mu = jnp.mean(h, axis=-1, keepdims=True)
    var = jnp.mean((h - mu) * (h - mu), axis=-1, keepdims=True)
    return (h - mu) * jax.lax.rsqrt(var + eps) * gamma + beta


def reference_forward(x, u, p, *, layer_norm=True):
    hp = jax.lax.Precision.HIGHEST
    xu = jnp.concatenate([x, u], axis=1)
    h1 = jnp.dot(xu, p["w1"], precision=hp) + p["b1"]
    if layer_norm:
        h1 = _ln_ref(h1, p["g1"], p["be1"])
    h1 = jnp.where(h1 >= 0, h1, 0.01 * h1)
    h2 = jnp.dot(h1, p["w2"], precision=hp) + p["b2"]
    if layer_norm:
        h2 = _ln_ref(h2, p["g2"], p["be2"])
    h2 = jnp.where(h2 >= 0, h2, 0.01 * h2)
    return jnp.dot(h2, p["w3"], precision=hp) + p["b3"]


# TODO(synk): RLNN's set_params/get_params/save/load and Critic.update() are host-side
# training utilities (flat-vector param IO, optimizer, replay buffer) and are not part
# of the forward pass implemented here.  Note: any such param-update path must preserve
# the zero padding produced by _pack_params (the padded-width LayerNorm relies on it).

if __name__ == "__main__":
    state_dim, action_dim, batch = 17, 6, 8

    key = jax.random.PRNGKey(0)
    kx, ku, kp = jax.random.split(key, 3)
    x = jax.random.normal(kx, (batch, state_dim), jnp.float32)
    u = jax.random.normal(ku, (batch, action_dim), jnp.float32)
    params = init_params(kp, state_dim, action_dim)

    # bf16 MXU operands vs. the f32 HIGHEST-precision reference -> expected ~1e-3
    # quantization noise; use a 2e-2 tolerance.
    TOL = 2e-2

    # LayerNorm branch (args.layer_norm = True)
    out_ln = jax.block_until_ready(
        pourchot_critic_forward(x, u, params, layer_norm=True))
    ref_ln = reference_forward(x, u, params, layer_norm=True)
    assert out_ln.shape == (batch, 1)
    assert jnp.allclose(out_ln, ref_ln, atol=TOL, rtol=TOL)

    # No-LayerNorm branch (args.layer_norm = False)
    out_nl = jax.block_until_ready(
        pourchot_critic_forward(x, u, params, layer_norm=False))
    ref_nl = reference_forward(x, u, params, layer_norm=False)
    assert out_nl.shape == (batch, 1)
    assert jnp.allclose(out_nl, ref_nl, atol=TOL, rtol=TOL)

    # Larger (CEM-population-style) batch exercising the 2-step parallel grid
    # (tile 160, batch padded 300 -> 320).
    big = 300
    kxb, kub = jax.random.split(jax.random.PRNGKey(1))
    xb = jax.random.normal(kxb, (big, state_dim), jnp.float32)
    ub = jax.random.normal(kub, (big, action_dim), jnp.float32)
    out_big = jax.block_until_ready(
        pourchot_critic_forward(xb, ub, params, layer_norm=True))
    ref_big = reference_forward(xb, ub, params, layer_norm=True)
    assert out_big.shape == (big, 1)
    assert jnp.allclose(out_big, ref_big, atol=TOL, rtol=TOL)

    print("KERNEL_OK")
</pallas_src>

<mosaic_0001>
module attributes {stable_mosaic.version = 11 : i64} {
  func.func @_critic_kernel(%arg0: i32, %arg1: memref<16x17xf32, #tpu.memory_space<vmem>>, %arg2: memref<16x6xf32, #tpu.memory_space<vmem>>, %arg3: memref<128x512xbf16, #tpu.memory_space<vmem>>, %arg4: memref<512x384xbf16, #tpu.memory_space<vmem>>, %arg5: memref<8x512xf32, #tpu.memory_space<vmem>>, %arg6: memref<16x1xf32, #tpu.memory_space<vmem>>) attributes {dimension_semantics = [#tpu.dimension_semantics<parallel>], iteration_bounds = array<i64: 1>, scalar_prefetch = 0 : i64, scratch_operands = 0 : i64, tpu.core_type = #tpu.core_type<tc>, window_params = [{transform_indices = @transform_0, window_bounds = array<i64: 16, 17>}, {transform_indices = @transform_1, window_bounds = array<i64: 16, 6>}, {pipeline_mode = #tpu.pipeline_mode<synchronous>, transform_indices = @transform_2, window_bounds = array<i64: 128, 512>}, {pipeline_mode = #tpu.pipeline_mode<synchronous>, transform_indices = @transform_3, window_bounds = array<i64: 512, 384>}, {pipeline_mode = #tpu.pipeline_mode<synchronous>, transform_indices = @transform_4, window_bounds = array<i64: 8, 512>}, {transform_indices = @transform_5, window_bounds = array<i64: 16, 1>}]} {
    %c0 = arith.constant 0 : index
    %c0_0 = arith.constant 0 : index
    %0 = vector.load %arg5[%c0, %c0_0] : memref<8x512xf32, #tpu.memory_space<vmem>>, vector<8x512xf32>
    %1 = vector.extract_strided_slice %0 {offsets = [0, 0], sizes = [1, 512], strides = [1, 1]} : vector<8x512xf32> to vector<1x512xf32>
    %2 = vector.extract_strided_slice %0 {offsets = [1, 0], sizes = [1, 512], strides = [1, 1]} : vector<8x512xf32> to vector<1x512xf32>
    %3 = vector.extract_strided_slice %0 {offsets = [2, 0], sizes = [1, 512], strides = [1, 1]} : vector<8x512xf32> to vector<1x512xf32>
    %4 = vector.extract_strided_slice %0 {offsets = [3, 0], sizes = [1, 384], strides = [1, 1]} : vector<8x512xf32> to vector<1x384xf32>
    %5 = vector.extract_strided_slice %0 {offsets = [4, 0], sizes = [1, 384], strides = [1, 1]} : vector<8x512xf32> to vector<1x384xf32>
    %6 = vector.extract_strided_slice %0 {offsets = [5, 0], sizes = [1, 384], strides = [1, 1]} : vector<8x512xf32> to vector<1x384xf32>
    %7 = vector.extract_strided_slice %0 {offsets = [6, 0], sizes = [1, 1], strides = [1, 1]} : vector<8x512xf32> to vector<1x1xf32>
    %8 = vector.extract_strided_slice %0 {offsets = [7, 0], sizes = [1, 384], strides = [1, 1]} : vector<8x512xf32> to vector<1x384xf32>
    %c0_1 = arith.constant 0 : index
    %c0_2 = arith.constant 0 : index
    %9 = vector.load %arg1[%c0_1, %c0_2] : memref<16x17xf32, #tpu.memory_space<vmem>>, vector<16x17xf32>
    %c0_3 = arith.constant 0 : index
    %c0_4 = arith.constant 0 : index
    %10 = vector.load %arg2[%c0_3, %c0_4] : memref<16x6xf32, #tpu.memory_space<vmem>>, vector<16x6xf32>
    %cst = arith.constant 0.000000e+00 : f32
    %11 = vector.broadcast %cst : f32 to vector<16x105xf32>
    %12 = tpu.concatenate %9, %10, %11 in 1 : vector<16x17xf32>, vector<16x6xf32>, vector<16x105xf32> -> vector<16x128xf32>
    %13 = arith.truncf %12 : vector<16x128xf32> to vector<16x128xbf16>
    %c0_5 = arith.constant 0 : index
    %c0_6 = arith.constant 0 : index
    %14 = vector.load %arg3[%c0_5, %c0_6] : memref<128x512xbf16, #tpu.memory_space<vmem>>, vector<128x512xbf16>
    %cst_7 = arith.constant dense<0.000000e+00> : vector<16x512xf32>
    %15 = tpu.matmul %13, %14, %cst_7 {dimension_numbers = #tpu.dot_dimension_numbers<[1], [0], [0], [1], [0, 0, 1, 1], [], []>} : vector<16x128xbf16>, vector<128x512xbf16>, vector<16x512xf32> -> vector<16x512xf32>
    %16 = vector.broadcast %1 : vector<1x512xf32> to vector<16x512xf32>
    %17 = arith.addf %15, %16 : vector<16x512xf32>
    %cst_8 = arith.constant dense<0.000000e+00> : vector<16xf32>
    %18 = vector.multi_reduction <add>, %17, %cst_8 [1] : vector<16x512xf32> to vector<16xf32>
    %19 = vector.shape_cast %18 : vector<16xf32> to vector<16x1xf32>
    %cst_9 = arith.constant 2.500000e-03 : f32
    %20 = vector.broadcast %cst_9 : f32 to vector<16x1xf32>
    %21 = arith.mulf %19, %20 : vector<16x1xf32>
    %22 = vector.broadcast %21 : vector<16x1xf32> to vector<16x512xf32>
    %23 = arith.subf %17, %22 : vector<16x512xf32>
    %24 = arith.mulf %23, %23 : vector<16x512xf32>
    %cst_10 = arith.constant dense<0.000000e+00> : vector<16xf32>
    %25 = vector.multi_reduction <add>, %24, %cst_10 [1] : vector<16x512xf32> to vector<16xf32>
    %26 = vector.shape_cast %25 : vector<16xf32> to vector<16x1xf32>
    %27 = arith.mulf %21, %21 : vector<16x1xf32>
    %cst_11 = arith.constant 1.120000e+02 : f32
    %28 = vector.broadcast %cst_11 : f32 to vector<16x1xf32>
    %29 = arith.mulf %28, %27 : vector<16x1xf32>
    %30 = arith.subf %26, %29 : vector<16x1xf32>
    %cst_12 = arith.constant 2.500000e-03 : f32
    %31 = vector.broadcast %cst_12 : f32 to vector<16x1xf32>
    %32 = arith.mulf %30, %31 : vector<16x1xf32>
    %cst_13 = arith.constant 0.000000e+00 : f32
    %33 = vector.broadcast %cst_13 : f32 to vector<16x1xf32>
    %34 = arith.maximumf %32, %33 : vector<16x1xf32>
    %cst_14 = arith.constant 9.99999974E-6 : f32
    %35 = vector.broadcast %cst_14 : f32 to vector<16x1xf32>
    %36 = arith.addf %34, %35 : vector<16x1xf32>
    %37 = math.rsqrt %36 : vector<16x1xf32>
    %38 = vector.broadcast %37 : vector<16x1xf32> to vector<16x512xf32>
    %39 = arith.mulf %23, %38 : vector<16x512xf32>
    %40 = vector.broadcast %2 : vector<1x512xf32> to vector<16x512xf32>
    %41 = arith.mulf %39, %40 : vector<16x512xf32>
    %42 = vector.broadcast %3 : vector<1x512xf32> to vector<16x512xf32>
    %43 = arith.addf %41, %42 : vector<16x512xf32>
    %cst_15 = arith.constant 0.00999999977 : f32
    %44 = vector.broadcast %cst_15 : f32 to vector<16x512xf32>
    %45 = arith.mulf %44, %43 : vector<16x512xf32>
    %46 = arith.maximumf %43, %45 : vector<16x512xf32>
    %47 = arith.truncf %46 : vector<16x512xf32> to vector<16x512xbf16>
    %c0_16 = arith.constant 0 : index
    %c0_17 = arith.constant 0 : index
    %48 = vector.load %arg4[%c0_16, %c0_17] : memref<512x384xbf16, #tpu.memory_space<vmem>>, vector<512x384xbf16>
    %cst_18 = arith.constant dense<0.000000e+00> : vector<16x384xf32>
    %49 = tpu.matmul %47, %48, %cst_18 {dimension_numbers = #tpu.dot_dimension_numbers<[1], [0], [0], [1], [0, 0, 1, 1], [], []>} : vector<16x512xbf16>, vector<512x384xbf16>, vector<16x384xf32> -> vector<16x384xf32>
    %50 = vector.broadcast %4 : vector<1x384xf32> to vector<16x384xf32>
    %51 = arith.addf %49, %50 : vector<16x384xf32>
    %cst_19 = arith.constant dense<0.000000e+00> : vector<16xf32>
    %52 = vector.multi_reduction <add>, %51, %cst_19 [1] : vector<16x384xf32> to vector<16xf32>
    %53 = vector.shape_cast %52 : vector<16xf32> to vector<16x1xf32>
    %cst_20 = arith.constant 0.00333333341 : f32
    %54 = vector.broadcast %cst_20 : f32 to vector<16x1xf32>
    %55 = arith.mulf %53, %54 : vector<16x1xf32>
    %56 = vector.broadcast %55 : vector<16x1xf32> to vector<16x384xf32>
    %57 = arith.subf %51, %56 : vector<16x384xf32>
    %58 = arith.mulf %57, %57 : vector<16x384xf32>
    %cst_21 = arith.constant dense<0.000000e+00> : vector<16xf32>
    %59 = vector.multi_reduction <add>, %58, %cst_21 [1] : vector<16x384xf32> to vector<16xf32>
    %60 = vector.shape_cast %59 : vector<16xf32> to vector<16x1xf32>
    %61 = arith.mulf %55, %55 : vector<16x1xf32>
    %cst_22 = arith.constant 8.400000e+01 : f32
    %62 = vector.broadcast %cst_22 : f32 to vector<16x1xf32>
    %63 = arith.mulf %62, %61 : vector<16x1xf32>
    %64 = arith.subf %60, %63 : vector<16x1xf32>
    %cst_23 = arith.constant 0.00333333341 : f32
    %65 = vector.broadcast %cst_23 : f32 to vector<16x1xf32>
    %66 = arith.mulf %64, %65 : vector<16x1xf32>
    %cst_24 = arith.constant 0.000000e+00 : f32
    %67 = vector.broadcast %cst_24 : f32 to vector<16x1xf32>
    %68 = arith.maximumf %66, %67 : vector<16x1xf32>
    %cst_25 = arith.constant 9.99999974E-6 : f32
    %69 = vector.broadcast %cst_25 : f32 to vector<16x1xf32>
    %70 = arith.addf %68, %69 : vector<16x1xf32>
    %71 = math.rsqrt %70 : vector<16x1xf32>
    %72 = vector.broadcast %71 : vector<16x1xf32> to vector<16x384xf32>
    %73 = arith.mulf %57, %72 : vector<16x384xf32>
    %74 = vector.broadcast %5 : vector<1x384xf32> to vector<16x384xf32>
    %75 = arith.mulf %73, %74 : vector<16x384xf32>
    %76 = vector.broadcast %6 : vector<1x384xf32> to vector<16x384xf32>
    %77 = arith.addf %75, %76 : vector<16x384xf32>
    %cst_26 = arith.constant 0.00999999977 : f32
    %78 = vector.broadcast %cst_26 : f32 to vector<16x384xf32>
    %79 = arith.mulf %78, %77 : vector<16x384xf32>
    %80 = arith.maximumf %77, %79 : vector<16x384xf32>
    %81 = vector.broadcast %8 : vector<1x384xf32> to vector<16x384xf32>
    %82 = arith.mulf %80, %81 : vector<16x384xf32>
    %cst_27 = arith.constant dense<0.000000e+00> : vector<16xf32>
    %83 = vector.multi_reduction <add>, %82, %cst_27 [1] : vector<16x384xf32> to vector<16xf32>
    %84 = vector.shape_cast %83 : vector<16xf32> to vector<16x1xf32>
    %85 = vector.broadcast %7 : vector<1x1xf32> to vector<16x1xf32>
    %86 = arith.addf %84, %85 : vector<16x1xf32>
    %c0_28 = arith.constant 0 : index
    %c0_29 = arith.constant 0 : index
    %87 = vector.load %arg6[%c0_28, %c0_29] : memref<16x1xf32, #tpu.memory_space<vmem>>, vector<16x1xf32>
    tpu.vector_store %arg6[%c0_28, %c0_29], %86 {strides = array<i32>} : memref<16x1xf32, #tpu.memory_space<vmem>>, vector<16x1xf32>,
    return
  }
  func.func @transform_0(%arg0: i32) -> (i32, i32) {
    %c0_i32 = arith.constant 0 : i32
    %c0_i32_0 = arith.constant 0 : i32
    return %arg0, %c0_i32 : i32, i32
  }
  func.func @transform_1(%arg0: i32) -> (i32, i32) {
    %c0_i32 = arith.constant 0 : i32
    %c0_i32_0 = arith.constant 0 : i32
    return %arg0, %c0_i32 : i32, i32
  }
  func.func @transform_2(%arg0: i32) -> (i32, i32) {
    %c0_i32 = arith.constant 0 : i32
    %c0_i32_0 = arith.constant 0 : i32
    %c0_i32_1 = arith.constant 0 : i32
    return %c0_i32, %c0_i32_0 : i32, i32
  }
  func.func @transform_3(%arg0: i32) -> (i32, i32) {
    %c0_i32 = arith.constant 0 : i32
    %c0_i32_0 = arith.constant 0 : i32
    %c0_i32_1 = arith.constant 0 : i32
    return %c0_i32, %c0_i32_0 : i32, i32
  }
  func.func @transform_4(%arg0: i32) -> (i32, i32) {
    %c0_i32 = arith.constant 0 : i32
    %c0_i32_0 = arith.constant 0 : i32
    %c0_i32_1 = arith.constant 0 : i32
    return %c0_i32, %c0_i32_0 : i32, i32
  }
  func.func @transform_5(%arg0: i32) -> (i32, i32) {
    %c0_i32 = arith.constant 0 : i32
    %c0_i32_0 = arith.constant 0 : i32
    return %arg0, %c0_i32 : i32, i32
  }
}

</mosaic_0001>

<bundles_post_ra>
// kernel: tpu_custom_call.1
= control target key start
LH: loop header
LB: loop body
LE: loop exit
PB: predicated region body
PF: predicated region fallthrough
CT: control target
= control target key end

     0   :  { %10 = vsyncpa [#allocation3], 0  ;;  %s2109_s0 = inlined_call_operand.vmem [shape: f32[16,17], index: 0, kind: input, shape index: {}]   ;;  %s2110_s1 = inlined_call_operand.vmem [shape: f32[16,6], index: 1, kind: input, shape index: {}]   ;;  %s2111_s2 = inlined_call_operand.hbm [shape: bf16[128,512], index: 2, kind: input, shape index: {}]   ;;  %s2112_s3 = inlined_call_operand.hbm [shape: bf16[512,384], index: 3, kind: input, shape index: {}]   ;;  %s2113_s4 = inlined_call_operand.hbm [shape: f32[8,512], index: 4, kind: input, shape index: {}]   ;;  %s2114_s5 = inlined_call_operand.vmem [shape: f32[16,1], index: 5, kind: output, shape index: {}]  }
   0x1   :  { %11 = vsyncpa [#allocation5], 0  ;;  %s1904_s18 = smov [#allocation4]  }
   0x2   :  { %s33_s19 = sshll.u32 %s1904_s18, 4  ;;  %s34_s19 = int_to_ptr.vmem [resolvable:$true] %s33_s19 }
   0x3   :  { %s1848_s20 = scalar_lea.vmem %s34_s19, 12288  ;;  %p1853_p1 = scmp.lt.s32.totalorder %s34_s19, %s34_s19 }
   0x4   :  { %p1849_p0 = scmp.ne.s32.totalorder %s34_s19, %s1848_s20  ;;  %p1854_p2 = scmp.lt.s32.totalorder %s1848_s20, %s1848_s20 }
   0x6   :  { %p1855_p3 = por %p1854_p2, %p1853_p1 }
   0x8   :  { %p1856_p4 = pnand %p1855_p3, %p1849_p0 }
   0xa   :  { %1859 = shalt.err (!%p1856_p4)
}
   0xb   :  { %s1905_s21 = smov 192   ;;  %s1906_s22 = smov 12  }
   0xc   :  { %39 = dma.hbm_to_vmem [thread:$0]  %s2112_s3, 12288, %s34_s19, [#allocation5], %s1905_s21, %s1905_s21, %s1906_s22  }
   0xd   :  { %s1907_s25 = smov [#allocation2]  }
   0xe   :  { %s21_s26 = sshll.u32 %s1907_s25, 4  ;;  %s22_s26 = int_to_ptr.vmem [resolvable:$true] %s21_s26 }
   0xf   :  { %s1868_s27 = scalar_lea.vmem %s22_s26, 4096  ;;  %p1873_p6 = scmp.lt.s32.totalorder %s22_s26, %s22_s26 }
  0x10   :  { %p1869_p5 = scmp.ne.s32.totalorder %s22_s26, %s1868_s27  ;;  %p1874_p7 = scmp.lt.s32.totalorder %s1868_s27, %s1868_s27 }
  0x12   :  { %p1875_p8 = por %p1874_p7, %p1873_p6 }
  0x14   :  { %p1876_p9 = pnand %p1875_p8, %p1869_p5 }
  0x16   :  { %1879 = shalt.err (!%p1876_p9)
}
  0x17   :  { %s1908_s28 = smov 256   ;;  %s1909_s29 = smov 16  }
  0x18   :  { %27 = dma.hbm_to_vmem [thread:$0]  %s2111_s2, 4096, %s22_s26, [#allocation3], %s1908_s28, %s1908_s28, %s1909_s29  }
  0x19   :  { %s1910_s7 = smov [#allocation6]  }
  0x1a   :  { %s46_s8 = sshll.u32 %s1910_s7, 4  ;;  %s47_s8 = int_to_ptr.vmem [resolvable:$true] %s46_s8 }
  0x1b   :  { %s1888_s3 = scalar_lea.vmem %s47_s8, 512  ;;  %p1893_p11 = scmp.lt.s32.totalorder %s47_s8, %s47_s8 }
  0x1c   :  { %p1889_p10 = scmp.ne.s32.totalorder %s47_s8, %s1888_s3  ;;  %p1894_p12 = scmp.lt.s32.totalorder %s1888_s3, %s1888_s3 }
  0x1e   :  { %p1895_p13 = por %p1894_p12, %p1893_p11 }
  0x20   :  { %p1896_p0 = pnand %p1895_p13, %p1889_p10 }
  0x22   :  { %1899 = shalt.err (!%p1896_p0)
}
  0x23   :  { %49 = dma.hbm_to_vmem [thread:$0]  %s2113_s4, 512, %s47_s8, [#allocation5]  }
  0x24   :  { %1900 = dma.done.wait [#allocation3], 4096  }
  0x25   :  { %1901 = vsyncadd [#allocation3], 4294963200 }
  0x26   :  { %1902 = dma.done.wait [#allocation5], 12800  }
  0x27   :  { %1903 = vsyncadd [#allocation5], 4294954496  ;;  %v1911_v0 = vmov 0   ;;  %v66_v1 = vld [vmem:[%s2110_s1] sm:$0xff]  ;;  %v67_v2 = vld [vmem:[%s2110_s1 + $0x8] sm:$0xff]  ;;  %s1912_s4 = smov 17   ;;  %v115_v44 = vlaneseq }
  0x28   :  { %323 = vmatprep.mubr.bf16.mxu0 %v1911_v0  ;;  %366 = vmatprep.mubr.bf16.mxu1 %v1911_v0  ;;  %v1651_v3 = vpack.i.bf16 %v67_v2, %v66_v1  ;;  %v1656_v4 = vld [vmem:[#allocation2 + $0xe4] ss:$16 sps:$4 sm:$0xff]   ;;  %v1658_v5 = vld [vmem:[#allocation2 + $0xec] ss:$16 sps:$4 sm:$0xff]   ;;  %v1660_v6 = vld [vmem:[#allocation2 + $0xe0] ss:$16 sps:$4 sm:$0xff]  }
  0x29   :  { %291 = vmatprep.subr.bf16.mxu0 %v1656_v4  ;;  %v1661_v7 = vld [vmem:[#allocation2 + $0xe8] ss:$16 sps:$4 sm:$0xff]   ;;  %334 = vmatprep.subr.bf16.mxu1 %v1658_v5  ;;  %v1662_v8 = vld [vmem:[#allocation2 + $0xc4] ss:$16 sps:$4 sm:$0xff]   ;;  %v1664_v9 = vld [vmem:[#allocation2 + $0xcc] ss:$16 sps:$4 sm:$0xff]  }
  0x2a   :  { %1652 = vrot.lane.b32.xlu0 %v1651_v3, %s1912_s4  ;;  %292 = vmatpush1.bf16.msra.mxu0 %v1660_v6  ;;  %v1666_v10 = vld [vmem:[#allocation2 + $0xc0] ss:$16 sps:$4 sm:$0xff]   ;;  %v1667_v11 = vld [vmem:[#allocation2 + $0xc8] ss:$16 sps:$4 sm:$0xff]   ;;  %v1668_v12 = vld [vmem:[#allocation2 + $0xa4] ss:$16 sps:$4 sm:$0xff]  }
  0x2b   :  { %335 = vmatpush1.bf16.msra.mxu1 %v1661_v7  ;;  %293 = vmatprep.subr.bf16.mxu0 %v1662_v8  ;;  %v1670_v13 = vld [vmem:[#allocation2 + $0xac] ss:$16 sps:$4 sm:$0xff]   ;;  %v1672_v14 = vld [vmem:[#allocation2 + $0xa0] ss:$16 sps:$4 sm:$0xff]   ;;  %v1673_v15 = vld [vmem:[#allocation2 + $0xa8] ss:$16 sps:$4 sm:$0xff]  }
  0x2c   :  { %336 = vmatprep.subr.bf16.mxu1 %v1664_v9  ;;  %v1674_v16 = vld [vmem:[#allocation2 + $0x84] ss:$16 sps:$4 sm:$0xff]   ;;  %v1676_v17 = vld [vmem:[#allocation2 + $0x8c] ss:$16 sps:$4 sm:$0xff]   ;;  %v1678_v18 = vld [vmem:[#allocation2 + $0x80] ss:$16 sps:$4 sm:$0xff]  }
  0x2d   :  { %v1679_v19 = vld [vmem:[#allocation2 + $0x88] ss:$16 sps:$4 sm:$0xff]   ;;  %v1680_v20 = vld [vmem:[#allocation2 + $0x64] ss:$16 sps:$4 sm:$0xff]   ;;  %v1682_v21 = vld [vmem:[#allocation2 + $0x6c] ss:$16 sps:$4 sm:$0xff]  }
  0x2e   :  { %294 = vmatpush1.bf16.msra.mxu0 %v1666_v10  ;;  %v1684_v22 = vld [vmem:[#allocation2 + $0x60] ss:$16 sps:$4 sm:$0xff]   ;;  %v1685_v23 = vld [vmem:[#allocation2 + $0x68] ss:$16 sps:$4 sm:$0xff]   ;;  %v1686_v24 = vld [vmem:[#allocation2 + $0x44] ss:$16 sps:$4 sm:$0xff]  }
  0x2f   :  { %337 = vmatpush1.bf16.msra.mxu1 %v1667_v11  ;;  %295 = vmatprep.subr.bf16.mxu0 %v1668_v12  ;;  %v1688_v25 = vld [vmem:[#allocation2 + $0x4c] ss:$16 sps:$4 sm:$0xff]   ;;  %v1690_v26 = vld [vmem:[#allocation2 + $0x40] ss:$16 sps:$4 sm:$0xff]   ;;  %v1691_v27 = vld [vmem:[#allocation2 + $0x48] ss:$16 sps:$4 sm:$0xff]  }
  0x30   :  { %338 = vmatprep.subr.bf16.mxu1 %v1670_v13  ;;  %v1692_v28 = vld [vmem:[#allocation2 + $0x24] ss:$16 sps:$4 sm:$0xff]   ;;  %v1694_v29 = vld [vmem:[#allocation2 + $0x2c] ss:$16 sps:$4 sm:$0xff]   ;;  %v1696_v30 = vld [vmem:[#allocation2 + $0x20] ss:$16 sps:$4 sm:$0xff]  }
  0x31   :  { %v1697_v31 = vld [vmem:[#allocation2 + $0x28] ss:$16 sps:$4 sm:$0xff]   ;;  %v1698_v32 = vld [vmem:[#allocation2 + $0x4] ss:$16 sps:$4 sm:$0xff]   ;;  %v1700_v33 = vld [vmem:[#allocation2 + $0xc] ss:$16 sps:$4 sm:$0xff]  }
  0x32   :  { %296 = vmatpush1.bf16.msra.mxu0 %v1672_v14  ;;  %v1702_v34 = vld [vmem:[#allocation2] ss:$16 sps:$4 sm:$0xff]   ;;  %v1703_v35 = vld [vmem:[#allocation2 + $0x8] ss:$16 sps:$4 sm:$0xff]   ;;  %vm76_vm0 = vcmask 138240   ;;  %vm79_vm1 = vcmask 187392  }
  0x33   :  { %339 = vmatpush1.bf16.msra.mxu1 %v1673_v15  ;;  %297 = vmatprep.subr.bf16.mxu0 %v1674_v16  ;;  %v64_v37 = vld [vmem:[%s2109_s0] sm:$0xff]  ;;  %v65_v38 = vld [vmem:[%s2109_s0 + $0x8] sm:$0xff]  ;;  %vm1496_vm2 = vmpackc.low %vm79_vm1, %vm79_vm1  ;;  %v1964_v45 = vshrl.u32 %v115_v44, 7  ;;  %vm1455_vm3 = vcmask 7168  }
  0x34   :  { %340 = vmatprep.subr.bf16.mxu1 %v1676_v17  ;;  %v1967_v47 = vld [vmem:[#allocation6] sm:$0xff]  ;;  %v1969_v48 = vld [vmem:[#allocation6 + $0x8] sm:$0xff]  ;;  %v1971_v49 = vld [vmem:[#allocation6 + $0x10] sm:$0xff] }
  0x35   :  { %v117_v46 = vsub.s32 0, %v1964_v45  ;;  %v1975_v54 = vld [vmem:[#allocation6 + $0x18] sm:$0xff]  ;;  %v1704_v13 = vld [vmem:[#allocation4 + $0xa8] ss:$12 sps:$4 sm:$0xff]  }
  0x36   :  { %298 = vmatpush1.bf16.msra.mxu0 %v1678_v18  ;;  %v1706_v14 = vld [vmem:[#allocation4 + $0xac] ss:$12 sps:$4 sm:$0xff]   ;;  %v1707_v15 = vld [vmem:[#allocation4 + $0x228] ss:$12 sps:$4 sm:$0xff]  }
  0x37   :  { %341 = vmatpush1.bf16.msra.mxu1 %v1679_v19  ;;  %299 = vmatprep.subr.bf16.mxu0 %v1680_v20  ;;  %v118_v50 = vrot.slane %v1967_v47, %v117_v46  ;;  %v122_v51 = vrot.slane %v1969_v48, %v117_v46  ;;  %v126_v55 = vrot.slane %v1971_v49, %v117_v46  ;;  %v1709_v16 = vld [vmem:[#allocation4 + $0x22c] ss:$12 sps:$4 sm:$0xff]   ;;  %v1712_v17 = vld [vmem:[#allocation4 + $0x94] ss:$12 sps:$4 sm:$0xff]   ;;  %v1710_v19 = vld [vmem:[#allocation4 + $0x90] ss:$12 sps:$4 sm:$0xff]  }
  0x38   :  { %342 = vmatprep.subr.bf16.mxu1 %v1682_v21  ;;  %v130_v60 = vrot.slane %v1975_v54, %v117_v46  ;;  %v1715_v18 = vld [vmem:[#allocation4 + $0x214] ss:$12 sps:$4 sm:$0xff]   ;;  %v1713_v20 = vld [vmem:[#allocation4 + $0x210] ss:$12 sps:$4 sm:$0xff]  }
  0x39   :  { %v1718_v21 = vld [vmem:[#allocation4 + $0x7c] ss:$12 sps:$4 sm:$0xff]  }
  0x3a   :  { %300 = vmatpush1.bf16.msra.mxu0 %v1684_v22  ;;  %v1721_v22 = vld [vmem:[#allocation4 + $0x1fc] ss:$12 sps:$4 sm:$0xff]  }
  0x3b   :  { %343 = vmatpush1.bf16.msra.mxu1 %v1685_v23  ;;  %301 = vmatprep.subr.bf16.mxu0 %v1686_v24  ;;  %v1716_v23 = vld [vmem:[#allocation4 + $0x78] ss:$12 sps:$4 sm:$0xff]  }
  0x3c   :  { %344 = vmatprep.subr.bf16.mxu1 %v1688_v25  ;;  %v1719_v24 = vld [vmem:[#allocation4 + $0x1f8] ss:$12 sps:$4 sm:$0xff]  }
  0x3d   :  { %v1724_v25 = vld [vmem:[#allocation4 + $0x64] ss:$12 sps:$4 sm:$0xff]  }
  0x3e   :  { %302 = vmatpush1.bf16.msra.mxu0 %v1690_v26  ;;  %v1727_v26 = vld [vmem:[#allocation4 + $0x1e4] ss:$12 sps:$4 sm:$0xff]  }
  0x3f   :  { %345 = vmatpush1.bf16.msra.mxu1 %v1691_v27  ;;  %303 = vmatprep.subr.bf16.mxu0 %v1692_v28  ;;  %v1722_v27 = vld [vmem:[#allocation4 + $0x60] ss:$12 sps:$4 sm:$0xff]  }
  0x40   :  { %346 = vmatprep.subr.bf16.mxu1 %v1694_v29  ;;  %v1725_v28 = vld [vmem:[#allocation4 + $0x1e0] ss:$12 sps:$4 sm:$0xff]  }
  0x41   :  { %v1730_v29 = vld [vmem:[#allocation4 + $0x4c] ss:$12 sps:$4 sm:$0xff]  }
  0x42   :  { %304 = vmatpush1.bf16.msra.mxu0 %v1696_v30  ;;  %v1733_v30 = vld [vmem:[#allocation4 + $0x1cc] ss:$12 sps:$4 sm:$0xff]  }
  0x43   :  { %347 = vmatpush1.bf16.msra.mxu1 %v1697_v31  ;;  %305 = vmatprep.subr.bf16.mxu0 %v1698_v32  ;;  %v1728_v31 = vld [vmem:[#allocation4 + $0x48] ss:$12 sps:$4 sm:$0xff]  }
  0x44   :  { %348 = vmatprep.subr.bf16.mxu1 %v1700_v33  ;;  %v1731_v32 = vld [vmem:[#allocation4 + $0x1c8] ss:$12 sps:$4 sm:$0xff]  }
  0x45   :  { %v1736_v33 = vld [vmem:[#allocation4 + $0x34] ss:$12 sps:$4 sm:$0xff]  }
  0x46   :  { %306 = vmatpush1.bf16.msra.mxu0 %v1702_v34  ;;  %v1739_v34 = vld [vmem:[#allocation4 + $0x1b4] ss:$12 sps:$4 sm:$0xff]  }
  0x47   :  { %349 = vmatpush1.bf16.msra.mxu1 %v1703_v35  ;;  %1157 = vmatprep.subr.bf16.mxu0 %v1706_v14  ;;  %v1734_v35 = vld [vmem:[#allocation4 + $0x30] ss:$12 sps:$4 sm:$0xff]   ;;  %v1752_v14 = vld [vmem:[#allocation4 + $0x168] ss:$12 sps:$4 sm:$0xff]  }
  0x48   :  { %1200 = vmatprep.subr.bf16.mxu1 %v1709_v16  ;;  %v1760_v16 = vld [vmem:[#allocation4 + $0x154] ss:$12 sps:$4 sm:$0xff]  }
  0x9c   :  { %v1653_v36 = vpop.permute.xlu0 %1652 }
  0x9d   :  { %v1655_v39 = vunpack.i.h.bf16 %v1653_v36  ;;  %v1654_v40 = vunpack.i.l.bf16 %v1653_v36  ;;  %v1737_v36 = vld [vmem:[#allocation4 + $0x1b0] ss:$12 sps:$4 sm:$0xff]  }
  0x9f   :  { %v77_v41 = vsel %vm76_vm0, %v64_v37, %v1654_v40  ;;  %v78_v42 = vsel %vm76_vm0, %v65_v38, %v1655_v39  ;;  %v1742_v37 = vld [vmem:[#allocation4 + $0x1c] ss:$12 sps:$4 sm:$0xff]   ;;  %v1740_v39 = vld [vmem:[#allocation4 + $0x18] ss:$12 sps:$4 sm:$0xff]  }
  0xa0   :  { %v1497_v43 = vpack.c.bf16 %v78_v42, %v77_v41  ;;  %v1745_v38 = vld [vmem:[#allocation4 + $0x19c] ss:$12 sps:$4 sm:$0xff]   ;;  %v1743_v40 = vld [vmem:[#allocation4 + $0x198] ss:$12 sps:$4 sm:$0xff]  }
  0xa2   :  { %1498 = vmatmul.mubr.msk.bf16.vlgmr.msra.gmra.mxu0 %vm1496_vm2, %v1497_v43  ;;  %1501 = vmatmul.mubr.msk.bf16.vlgmr.msra.gmra.mxu1 %vm1496_vm2, %v1497_v43 }
  0xa3   :  { %1158 = vmatpush1.bf16.msra.mxu0 %v1704_v13  ;;  %1201 = vmatpush1.bf16.msra.mxu1 %v1707_v15  ;;  %v1757_v13 = vld [vmem:[#allocation4 + $0x2ec] ss:$12 sps:$4 sm:$0xff]   ;;  %v1755_v15 = vld [vmem:[#allocation4 + $0x2e8] ss:$12 sps:$4 sm:$0xff]  }
  0xa4   :  { %1159 = vmatprep.subr.bf16.mxu0 %v1712_v17  ;;  %1202 = vmatprep.subr.bf16.mxu1 %v1715_v18  ;;  %v1763_v17 = vld [vmem:[#allocation4 + $0x2d4] ss:$12 sps:$4 sm:$0xff]   ;;  %v1758_v18 = vld [vmem:[#allocation4 + $0x150] ss:$12 sps:$4 sm:$0xff]  }
  0xa7   :  { %1160 = vmatpush1.bf16.msra.mxu0 %v1710_v19  ;;  %1203 = vmatpush1.bf16.msra.mxu1 %v1713_v20  ;;  %v1761_v19 = vld [vmem:[#allocation4 + $0x2d0] ss:$12 sps:$4 sm:$0xff]   ;;  %v1764_v20 = vld [vmem:[#allocation4 + $0x138] ss:$12 sps:$4 sm:$0xff]  }
  0xa8   :  { %1161 = vmatprep.subr.bf16.mxu0 %v1718_v21  ;;  %1204 = vmatprep.subr.bf16.mxu1 %v1721_v22  ;;  %v1766_v21 = vld [vmem:[#allocation4 + $0x13c] ss:$12 sps:$4 sm:$0xff]   ;;  %v1767_v22 = vld [vmem:[#allocation4 + $0x2b8] ss:$12 sps:$4 sm:$0xff]  }
  0xab   :  { %1162 = vmatpush1.bf16.msra.mxu0 %v1716_v23  ;;  %1205 = vmatpush1.bf16.msra.mxu1 %v1719_v24  ;;  %v1769_v23 = vld [vmem:[#allocation4 + $0x2bc] ss:$12 sps:$4 sm:$0xff]   ;;  %v1772_v24 = vld [vmem:[#allocation4 + $0x124] ss:$12 sps:$4 sm:$0xff]  }
  0xac   :  { %1163 = vmatprep.subr.bf16.mxu0 %v1724_v25  ;;  %1206 = vmatprep.subr.bf16.mxu1 %v1727_v26  ;;  %v1775_v25 = vld [vmem:[#allocation4 + $0x2a4] ss:$12 sps:$4 sm:$0xff]   ;;  %v1770_v26 = vld [vmem:[#allocation4 + $0x120] ss:$12 sps:$4 sm:$0xff]  }
  0xaf   :  { %1164 = vmatpush1.bf16.msra.mxu0 %v1722_v27  ;;  %1207 = vmatpush1.bf16.msra.mxu1 %v1725_v28  ;;  %v1773_v27 = vld [vmem:[#allocation4 + $0x2a0] ss:$12 sps:$4 sm:$0xff]  }
  0xb0   :  { %1165 = vmatprep.subr.bf16.mxu0 %v1730_v29  ;;  %1208 = vmatprep.subr.bf16.mxu1 %v1733_v30  ;;  %v1778_v28 = vld [vmem:[#allocation4 + $0x10c] ss:$12 sps:$4 sm:$0xff]   ;;  %v1776_v30 = vld [vmem:[#allocation4 + $0x108] ss:$12 sps:$4 sm:$0xff]  }
  0xb1   :  { %v1781_v29 = vld [vmem:[#allocation4 + $0x28c] ss:$12 sps:$4 sm:$0xff]  }
  0xb3   :  { %1166 = vmatpush1.bf16.msra.mxu0 %v1728_v31  ;;  %1209 = vmatpush1.bf16.msra.mxu1 %v1731_v32  ;;  %v1779_v31 = vld [vmem:[#allocation4 + $0x288] ss:$12 sps:$4 sm:$0xff]  }
  0xb4   :  { %1167 = vmatprep.subr.bf16.mxu0 %v1736_v33  ;;  %1210 = vmatprep.subr.bf16.mxu1 %v1739_v34  ;;  %v1784_v32 = vld [vmem:[#allocation4 + $0xf4] ss:$12 sps:$4 sm:$0xff]   ;;  %v1782_v34 = vld [vmem:[#allocation4 + $0xf0] ss:$12 sps:$4 sm:$0xff]  }
  0xb5   :  { %v1787_v33 = vld [vmem:[#allocation4 + $0x274] ss:$12 sps:$4 sm:$0xff]  }
  0xb7   :  { %1168 = vmatpush1.bf16.msra.mxu0 %v1734_v35  ;;  %1211 = vmatpush1.bf16.msra.mxu1 %v1737_v36  ;;  %v1785_v35 = vld [vmem:[#allocation4 + $0x270] ss:$12 sps:$4 sm:$0xff]  }
  0xb8   :  { %1169 = vmatprep.subr.bf16.mxu0 %v1742_v37  ;;  %1212 = vmatprep.subr.bf16.mxu1 %v1745_v38  ;;  %v1790_v36 = vld [vmem:[#allocation4 + $0xdc] ss:$12 sps:$4 sm:$0xff]   ;;  %v1788_v38 = vld [vmem:[#allocation4 + $0xd8] ss:$12 sps:$4 sm:$0xff]  }
  0xb9   :  { %v1793_v37 = vld [vmem:[#allocation4 + $0x25c] ss:$12 sps:$4 sm:$0xff]  }
  0xbb   :  { %1170 = vmatpush1.bf16.msra.mxu0 %v1740_v39  ;;  %1213 = vmatpush1.bf16.msra.mxu1 %v1743_v40  ;;  %v1791_v39 = vld [vmem:[#allocation4 + $0x258] ss:$12 sps:$4 sm:$0xff]  }
  0xbc   :  { %v1796_v40 = vld [vmem:[#allocation4 + $0xc4] ss:$12 sps:$4 sm:$0xff]  }
 0x162   :  { %v325_v52 = vpop.f32.mrf.mxu0  ;;  %v368_v53 = vpop.f32.mrf.mxu1 }
 0x163   :  { %v1978_v58 = vadd.f32 %v325_v52, %v118_v50  ;;  %v1983_v63 = vadd.f32 %v368_v53, %v126_v55 }
 0x164   :  { %v327_v56 = vpop.f32.mrf.mxu0  ;;  %v370_v57 = vpop.f32.mrf.mxu1 }
 0x165   :  { %v1980_v59 = vadd.f32 %v327_v56, %v122_v51  ;;  %v1987_v2 = vadd.f32 %v370_v57, %v130_v60 }
 0x166   :  { %v329_v61 = vpop.f32.mrf.mxu0  ;;  %v372_v62 = vpop.f32.mrf.mxu1 }
 0x167   :  { %v377_v0 = vadd.f32 %v1980_v59, %v1978_v58  ;;  %v1989_v3 = vadd.f32 %v329_v61, %v118_v50  ;;  %v1994_v7 = vadd.f32 %v372_v62, %v126_v55 }
 0x168   :  { %v331_v1 = vpop.f32.mrf.mxu0  ;;  %v374_v6 = vpop.f32.mrf.mxu1 }
 0x169   :  { %v1991_v4 = vadd.f32 %v331_v1, %v122_v51  ;;  %v378_v5 = vadd.f32 %v377_v0, %v1983_v63  ;;  %v1999_v10 = vadd.f32 %v374_v6, %v130_v60 }
 0x16b   :  { %v382_v8 = vadd.f32 %v1991_v4, %v1989_v3  ;;  %v379_v9 = vadd.f32 %v378_v5, %v1987_v2 }
 0x16d   :  { %380 = vadd.xlane.f32.xlu0 %v379_v9  ;;  %v383_v11 = vadd.f32 %v382_v8, %v1994_v7  ;;  %v1748_v8 = vld [vmem:[#allocation4 + $0x4] ss:$12 sps:$4 sm:$0xff]  }
 0x16e   :  { %v1751_v9 = vld [vmem:[#allocation4 + $0x184] ss:$12 sps:$4 sm:$0xff]   ;;  %1171 = vmatprep.subr.bf16.mxu0 %v1748_v8 }
 0x16f   :  { %v384_v12 = vadd.f32 %v383_v11, %v1999_v10  ;;  %v1749_v11 = vld [vmem:[#allocation4 + $0x180] ss:$12 sps:$4 sm:$0xff]   ;;  %1214 = vmatprep.subr.bf16.mxu1 %v1751_v9 }
 0x170   :  { %1215 = vmatpush1.bf16.msra.mxu1 %v1749_v11  ;;  %v439_v11 = vsub.s32 1, %v1964_v45 }
 0x171   :  { %385 = vadd.xlane.f32.xlu1 %v384_v12  ;;  %v1754_v12 = vld [vmem:[#allocation4 + $0x16c] ss:$12 sps:$4 sm:$0xff]   ;;  %1216 = vmatprep.subr.bf16.mxu1 %v1757_v13 }
 0x172   :  { %v440_v13 = vrot.slane %v1967_v47, %v439_v11 }
 0x174   :  { %1217 = vmatpush2.bf16.msra.mxu1 %v1755_v15 }
 0x175   :  { %1218 = vmatprep.subr.bf16.mxu1 %v1763_v17 }
 0x178   :  { %1219 = vmatpush2.bf16.msra.mxu1 %v1761_v19 }
 0x179   :  { %1220 = vmatprep.subr.bf16.mxu1 %v1769_v23 }
 0x17c   :  { %1221 = vmatpush2.bf16.msra.mxu1 %v1767_v22 }
 0x17d   :  { %1222 = vmatprep.subr.bf16.mxu1 %v1775_v25 }
 0x180   :  { %1223 = vmatpush2.bf16.msra.mxu1 %v1773_v27 }
 0x181   :  { %1224 = vmatprep.subr.bf16.mxu1 %v1781_v29 }
 0x184   :  { %1225 = vmatpush2.bf16.msra.mxu1 %v1779_v31 }
 0x185   :  { %1226 = vmatprep.subr.bf16.mxu1 %v1787_v33 }
 0x188   :  { %1227 = vmatpush2.bf16.msra.mxu1 %v1785_v35 }
 0x189   :  { %1228 = vmatprep.subr.bf16.mxu1 %v1793_v37 }
 0x18c   :  { %1229 = vmatpush2.bf16.msra.mxu1 %v1791_v39 }
 0x1f6   :  { %v381_v41 = vpop.xlane.xlu0 %380 }
 0x1f7   :  { %v2003_v42 = vmul.f32 0.0025, %v381_v41  ;;  %v1799_v41 = vld [vmem:[#allocation4 + $0x244] ss:$12 sps:$4 sm:$0xff]  }
 0x1f8   :  { %1230 = vmatprep.subr.bf16.mxu1 %v1799_v41 }
 0x1f9   :  { %v2007_v43 = vsub.f32 %v1978_v58, %v2003_v42  ;;  %v2011_v44 = vsub.f32 %v1980_v59, %v2003_v42  ;;  %v2015_v46 = vsub.f32 %v1983_v63, %v2003_v42  ;;  %v2019_v51 = vsub.f32 %v1987_v2, %v2003_v42 }
 0x1fa   :  { %v386_v50 = vpop.xlane.xlu1 %385 }
 0x1fb   :  { %v2021_v52 = vmul.f32 0.0025, %v386_v50  ;;  %v397_v53 = vmul.f32 %v2007_v43, %v2007_v43  ;;  %v398_v55 = vmul.f32 %v2011_v44, %v2011_v44  ;;  %v399_v56 = vmul.f32 %v2015_v46, %v2015_v46  ;;  %v1794_v50 = vld [vmem:[#allocation4 + $0xc0] ss:$12 sps:$4 sm:$0xff]  }
 0x1fc   :  { %v400_v61 = vmul.f32 %v2019_v51, %v2019_v51 }
 0x1fd   :  { %v405_v57 = vadd.f32 %v398_v55, %v397_v53  ;;  %v2031_v58 = vsub.f32 %v1989_v3, %v2021_v52  ;;  %v2035_v59 = vsub.f32 %v1991_v4, %v2021_v52  ;;  %v2039_v60 = vsub.f32 %v1994_v7, %v2021_v52  ;;  %v1797_v53 = vld [vmem:[#allocation4 + $0x240] ss:$12 sps:$4 sm:$0xff]   ;;  %v1800_v55 = vld [vmem:[#allocation4 + $0x170] ss:$12 sps:$4 sm:$0xff]  }
 0x1fe   :  { %v2045_v63 = vsub.f32 %v1999_v10, %v2021_v52  ;;  %v1746_v10 = vld [vmem:[#allocation4] ss:$12 sps:$4 sm:$0xff]   ;;  %1231 = vmatpush2.bf16.msra.mxu1 %v1797_v53 }
 0x1ff   :  { %v406_v62 = vadd.f32 %v405_v57, %v399_v56  ;;  %v401_v0 = vmul.f32 %v2031_v58, %v2031_v58  ;;  %v402_v1 = vmul.f32 %v2035_v59, %v2035_v59  ;;  %v403_v3 = vmul.f32 %v2039_v60, %v2039_v60  ;;  %1172 = vmatpush1.bf16.msra.mxu0 %v1746_v10  ;;  %v1801_v56 = vld [vmem:[#allocation4 + $0x2f0] ss:$12 sps:$4 sm:$0xff]  }
 0x200   :  { %v404_v5 = vmul.f32 %v2045_v63, %v2045_v63  ;;  %1173 = vmatprep.subr.bf16.mxu0 %v1754_v12  ;;  %1620 = vmatprep.subr.bf16.mxu1 %v1801_v56  ;;  %v415_v57 = vmul.f32 %v2003_v42, %v2003_v42  ;;  %v463_v42 = vsub.s32 2, %v1964_v45  ;;  %v452_v12 = vrot.slane %v1975_v54, %v439_v11 }
 0x201   :  { %v407_v2 = vadd.f32 %v406_v62, %v400_v61  ;;  %v410_v4 = vadd.f32 %v402_v1, %v401_v0  ;;  %v416_v62 = vmul.f32 %v2021_v52, %v2021_v52  ;;  %v444_v52 = vrot.slane %v1969_v48, %v439_v11 }
 0x202   :  { %v417_v61 = vmul.f32 112.0, %v415_v57  ;;  %v468_v17 = vrot.slane %v1969_v48, %v463_v42  ;;  %v464_v22 = vrot.slane %v1967_v47, %v463_v42  ;;  %v472_v23 = vrot.slane %v1971_v49, %v463_v42 }
 0x203   :  { %408 = vadd.xlane.f32.xlu1 %v407_v2  ;;  %v411_v6 = vadd.f32 %v410_v4, %v403_v3  ;;  %1174 = vmatpush2.bf16.msra.mxu0 %v1752_v14  ;;  %v418_v3 = vmul.f32 112.0, %v416_v62  ;;  %v448_v14 = vrot.slane %v1971_v49, %v439_v11  ;;  %v1806_v11 = vld [vmem:[#allocation4 + $0x98] ss:$12 sps:$4 sm:$0xff]  }
 0x204   :  { %1175 = vmatprep.subr.bf16.mxu0 %v1760_v16  ;;  %v476_v16 = vrot.slane %v1975_v54, %v463_v42  ;;  %v1807_v42 = vld [vmem:[#allocation4 + $0x218] ss:$12 sps:$4 sm:$0xff]  }
 0x205   :  { %v412_v7 = vadd.f32 %v411_v6, %v404_v5 }
 0x207   :  { %413 = vadd.xlane.f32.xlu1 %v412_v7  ;;  %1176 = vmatpush2.bf16.msra.mxu0 %v1758_v18 }
 0x208   :  { %1177 = vmatprep.subr.bf16.mxu0 %v1766_v21 }
 0x20b   :  { %1178 = vmatpush2.bf16.msra.mxu0 %v1764_v20 }
 0x20c   :  { %1179 = vmatprep.subr.bf16.mxu0 %v1772_v24 }
 0x20f   :  { %1180 = vmatpush2.bf16.msra.mxu0 %v1770_v26 }
 0x210   :  { %1181 = vmatprep.subr.bf16.mxu0 %v1778_v28 }
 0x213   :  { %1182 = vmatpush2.bf16.msra.mxu0 %v1776_v30 }
 0x214   :  { %1183 = vmatprep.subr.bf16.mxu0 %v1784_v32 }
 0x217   :  { %1184 = vmatpush2.bf16.msra.mxu0 %v1782_v34 }
 0x218   :  { %1185 = vmatprep.subr.bf16.mxu0 %v1790_v36 }
 0x21b   :  { %1186 = vmatpush2.bf16.msra.mxu0 %v1788_v38 }
 0x21c   :  { %1187 = vmatprep.subr.bf16.mxu0 %v1796_v40 }
 0x21f   :  { %1188 = vmatpush2.bf16.msra.mxu0 %v1794_v50 }
 0x220   :  { %1598 = vmatprep.subr.bf16.mxu0 %v1800_v55 }
 0x28c   :  { %v409_v0 = vpop.xlane.xlu1 %408 }
 0x28d   :  { %v419_v1 = vsub.f32 %v409_v0, %v417_v61 }
 0x28f   :  { %v421_v2 = vmul.f32 0.0025, %v419_v1 }
 0x290   :  { %v414_v4 = vpop.xlane.xlu1 %413 }
 0x291   :  { %v423_v5 = vmax.f32 %v421_v2, 0.0  ;;  %v420_v6 = vsub.f32 %v414_v4, %v418_v3 }
 0x293   :  { %v425_v7 = vadd.f32 1e-05, %v423_v5  ;;  %v422_v8 = vmul.f32 0.0025, %v420_v6  ;;  %v1802_v5 = vld [vmem:[#allocation4 + $0xb0] ss:$12 sps:$4 sm:$0xff]  }
 0x294   :  { %v1803_v6 = vld [vmem:[#allocation4 + $0x230] ss:$12 sps:$4 sm:$0xff]  }
 0x295   :  { %1832 = vrsqrt.f32 %v425_v7  ;;  %v424_v9 = vmax.f32 %v422_v8, 0.0 }
 0x297   :  { %v426_v10 = vadd.f32 1e-05, %v424_v9  ;;  %v1804_v9 = vld [vmem:[#allocation4 + $0x158] ss:$12 sps:$4 sm:$0xff]  }
 0x299   :  { %1834 = vrsqrt.f32 %v426_v10  ;;  %v1805_v10 = vld [vmem:[#allocation4 + $0x2d8] ss:$12 sps:$4 sm:$0xff]  }
 0x2a2   :  { %v1833_v15 = vpop.eup %1832 }
 0x2a3   :  { %v430_v18 = vmul.f32 %v1833_v15, %v2011_v44  ;;  %v432_v19 = vmul.f32 %v1833_v15, %v2019_v51  ;;  %v429_v20 = vmul.f32 %v1833_v15, %v2007_v43  ;;  %v431_v21 = vmul.f32 %v1833_v15, %v2015_v46  ;;  %v1812_v15 = vld [vmem:[#allocation4 + $0x128] ss:$12 sps:$4 sm:$0xff]  }
 0x2a5   :  { %v454_v24 = vmul.f32 %v444_v52, %v430_v18  ;;  %v456_v25 = vmul.f32 %v452_v12, %v432_v19  ;;  %v453_v26 = vmul.f32 %v440_v13, %v429_v20  ;;  %v455_v27 = vmul.f32 %v448_v14, %v431_v21  ;;  %v1815_v18 = vld [vmem:[#allocation4 + $0x1e8] ss:$12 sps:$4 sm:$0xff]   ;;  %v1816_v19 = vld [vmem:[#allocation4 + $0x110] ss:$12 sps:$4 sm:$0xff]  }
 0x2a6   :  { %v1835_v28 = vpop.eup %1834  ;;  %v1817_v20 = vld [vmem:[#allocation4 + $0x290] ss:$12 sps:$4 sm:$0xff]  }
 0x2a7   :  { %v434_v54 = vmul.f32 %v1835_v28, %v2035_v59  ;;  %v478_v29 = vadd.f32 %v468_v17, %v454_v24  ;;  %v436_v44 = vmul.f32 %v1835_v28, %v2045_v63  ;;  %v480_v30 = vadd.f32 %v476_v16, %v456_v25  ;;  %v1818_v21 = vld [vmem:[#allocation4 + $0x50] ss:$12 sps:$4 sm:$0xff]   ;;  %v1821_v24 = vld [vmem:[#allocation4 + $0x278] ss:$12 sps:$4 sm:$0xff]  }
 0x2a8   :  { %v433_v51 = vmul.f32 %v1835_v28, %v2031_v58  ;;  %v477_v43 = vadd.f32 %v464_v22, %v453_v26  ;;  %v435_v46 = vmul.f32 %v1835_v28, %v2039_v60  ;;  %v479_v31 = vadd.f32 %v472_v23, %v455_v27  ;;  %v1822_v25 = vld [vmem:[#allocation4 + $0x38] ss:$12 sps:$4 sm:$0xff]   ;;  %v1824_v27 = vld [vmem:[#allocation4 + $0xe0] ss:$12 sps:$4 sm:$0xff]  }
 0x2a9   :  { %v458_v32 = vmul.f32 %v444_v52, %v434_v54  ;;  %v460_v33 = vmul.f32 %v452_v12, %v436_v44  ;;  %v486_v37 = vmul.f32 0.01, %v478_v29  ;;  %v488_v39 = vmul.f32 0.01, %v480_v30  ;;  %v1808_v12 = vld [vmem:[#allocation4 + $0x140] ss:$12 sps:$4 sm:$0xff]  }
 0x2aa   :  { %v457_v34 = vmul.f32 %v440_v13, %v433_v51  ;;  %v459_v35 = vmul.f32 %v448_v14, %v435_v46  ;;  %v485_v59 = vmul.f32 0.01, %v477_v43  ;;  %v487_v50 = vmul.f32 0.01, %v479_v31  ;;  %v1809_v52 = vld [vmem:[#allocation4 + $0x2c0] ss:$12 sps:$4 sm:$0xff]  }
 0x2ab   :  { %v482_v36 = vadd.f32 %v468_v17, %v458_v32  ;;  %v484_v38 = vadd.f32 %v476_v16, %v460_v33  ;;  %v494_v56 = vmax.f32 %v478_v29, %v486_v37  ;;  %v496_v60 = vmax.f32 %v480_v30, %v488_v39  ;;  %v1810_v13 = vld [vmem:[#allocation4 + $0x80] ss:$12 sps:$4 sm:$0xff]   ;;  %v1813_v16 = vld [vmem:[#allocation4 + $0x2a8] ss:$12 sps:$4 sm:$0xff]   ;;  %v1823_v26 = vld [vmem:[#allocation4 + $0x1b8] ss:$12 sps:$4 sm:$0xff]  }
 0x2ac   :  { %v481_v40 = vadd.f32 %v464_v22, %v457_v34  ;;  %v483_v41 = vadd.f32 %v472_v23, %v459_v35  ;;  %v493_v62 = vmax.f32 %v477_v43, %v485_v59  ;;  %v495_v1 = vmax.f32 %v479_v31, %v487_v50  ;;  %v1811_v14 = vld [vmem:[#allocation4 + $0x200] ss:$12 sps:$4 sm:$0xff]   ;;  %v1814_v17 = vld [vmem:[#allocation4 + $0x68] ss:$12 sps:$4 sm:$0xff]   ;;  %v1819_v22 = vld [vmem:[#allocation4 + $0x1d0] ss:$12 sps:$4 sm:$0xff]  }
 0x2ad   :  { %v490_v63 = vmul.f32 0.01, %v482_v36  ;;  %v492_v53 = vmul.f32 0.01, %v484_v38  ;;  %v1820_v23 = vld [vmem:[#allocation4 + $0xf8] ss:$12 sps:$4 sm:$0xff]  }
 0x2ae   :  { %v489_v55 = vmul.f32 0.01, %v481_v40  ;;  %v491_v58 = vmul.f32 0.01, %v483_v41  ;;  %v1825_v28 = vld [vmem:[#allocation4 + $0x260] ss:$12 sps:$4 sm:$0xff]  }
 0x2af   :  { %v498_v57 = vmax.f32 %v482_v36, %v490_v63  ;;  %v500_v61 = vmax.f32 %v484_v38, %v492_v53  ;;  %v1826_v54 = vld [vmem:[#allocation4 + $0x20] ss:$12 sps:$4 sm:$0xff]   ;;  %v1828_v44 = vld [vmem:[#allocation4 + $0xc8] ss:$12 sps:$4 sm:$0xff]   ;;  %v635_v34 = vsub.s32 3, %v1964_v45 }
 0x2b0   :  { %v497_v0 = vmax.f32 %v481_v40, %v489_v55  ;;  %v499_v2 = vmax.f32 %v483_v41, %v491_v58  ;;  %v1827_v29 = vld [vmem:[#allocation4 + $0x1a0] ss:$12 sps:$4 sm:$0xff]   ;;  %v1829_v30 = vld [vmem:[#allocation4 + $0x248] ss:$12 sps:$4 sm:$0xff]  }
 0x2b1   :  { %v502_v3 = vpack.c.bf16 %v498_v57, %v494_v56  ;;  %v504_v4 = vpack.c.bf16 %v500_v61, %v496_v60  ;;  %v1830_v51 = vld [vmem:[#allocation4 + $0x8] ss:$12 sps:$4 sm:$0xff]   ;;  %v640_v37 = vrot.slane %v1969_v48, %v635_v34  ;;  %v636_v38 = vrot.slane %v1967_v47, %v635_v34 }
 0x2b2   :  { %v2077_v7 = vpack.c.bf16 %v497_v0, %v493_v62  ;;  %v2079_v8 = vpack.c.bf16 %v499_v2, %v495_v1  ;;  %v1831_v43 = vld [vmem:[#allocation4 + $0x188] ss:$12 sps:$4 sm:$0xff]   ;;  %v644_v53 = vrot.slane %v1971_v49, %v635_v34 }
 0x2b3   :  { %1189 = vmatprep.mubr.bf16.mxu0 %v502_v3  ;;  %1232 = vmatprep.mubr.bf16.mxu1 %v504_v4 }
 0x2b4   :  { %1190 = vmatmul.mubr.bf16.vlgmr.msra.gmra.mxu0 %v2077_v7  ;;  %1233 = vmatmul.mubr.bf16.vlgmr.msra.gmra.mxu1 %v2079_v8 }
 0x2b5   :  { %1599 = vmatpush3.bf16.msra.mxu0 %v1802_v5  ;;  %1621 = vmatpush3.bf16.msra.mxu1 %v1803_v6 }
 0x2b6   :  { %1275 = vmatprep.mubr.bf16.mxu0 %v502_v3  ;;  %1316 = vmatprep.mubr.bf16.mxu1 %v504_v4 }
 0x2b7   :  { %1600 = vmatprep.subr.bf16.mxu0 %v1804_v9  ;;  %1622 = vmatprep.subr.bf16.mxu1 %v1805_v10 }
 0x2b9   :  { %1601 = vmatpush3.bf16.msra.mxu0 %v1806_v11  ;;  %1623 = vmatpush3.bf16.msra.mxu1 %v1807_v42 }
 0x2ba   :  { %1602 = vmatprep.subr.bf16.mxu0 %v1808_v12  ;;  %1624 = vmatprep.subr.bf16.mxu1 %v1809_v52 }
 0x2bd   :  { %1603 = vmatpush3.bf16.msra.mxu0 %v1810_v13  ;;  %1625 = vmatpush3.bf16.msra.mxu1 %v1811_v14 }
 0x2be   :  { %1604 = vmatprep.subr.bf16.mxu0 %v1812_v15  ;;  %1626 = vmatprep.subr.bf16.mxu1 %v1813_v16 }
 0x2c1   :  { %1605 = vmatpush3.bf16.msra.mxu0 %v1814_v17  ;;  %1627 = vmatpush3.bf16.msra.mxu1 %v1815_v18 }
 0x2c2   :  { %1606 = vmatprep.subr.bf16.mxu0 %v1816_v19  ;;  %1628 = vmatprep.subr.bf16.mxu1 %v1817_v20 }
 0x2c5   :  { %1607 = vmatpush3.bf16.msra.mxu0 %v1818_v21  ;;  %1629 = vmatpush3.bf16.msra.mxu1 %v1819_v22 }
 0x2c6   :  { %1608 = vmatprep.subr.bf16.mxu0 %v1820_v23  ;;  %1630 = vmatprep.subr.bf16.mxu1 %v1821_v24 }
 0x2c9   :  { %1609 = vmatpush3.bf16.msra.mxu0 %v1822_v25  ;;  %1631 = vmatpush3.bf16.msra.mxu1 %v1823_v26 }
 0x2ca   :  { %1610 = vmatprep.subr.bf16.mxu0 %v1824_v27  ;;  %1632 = vmatprep.subr.bf16.mxu1 %v1825_v28 }
 0x2cd   :  { %1611 = vmatpush3.bf16.msra.mxu0 %v1826_v54  ;;  %1633 = vmatpush3.bf16.msra.mxu1 %v1827_v29 }
 0x2ce   :  { %1612 = vmatprep.subr.bf16.mxu0 %v1828_v44  ;;  %1634 = vmatprep.subr.bf16.mxu1 %v1829_v30 }
 0x2d1   :  { %1613 = vmatpush3.bf16.msra.mxu0 %v1830_v51  ;;  %1635 = vmatpush3.bf16.msra.mxu1 %v1831_v43 }
 0x2d4   :  { %1276 = vmatmul.mubr.bf16.vlgmr.msra.gmra.mxu0 %v2077_v7  ;;  %1317 = vmatmul.mubr.bf16.vlgmr.msra.gmra.mxu1 %v2079_v8 }
 0x374   :  { %v1191_v46 = vpop.f32.mrf.mxu0  ;;  %v1234_v31 = vpop.f32.mrf.mxu1 }
 0x375   :  { %v1192_v63 = vadd.f32 %v1191_v46, %v636_v38 }
 0x376   :  { %v1193_v32 = vpop.f32.mrf.mxu0  ;;  %v1236_v33 = vpop.f32.mrf.mxu1 }
 0x377   :  { %v1194_v59 = vadd.f32 %v1193_v32, %v640_v37  ;;  %v1235_v0 = vadd.f32 %v1234_v31, %v1192_v63  ;;  %v1377_v63 = vsub.s32 4, %v1964_v45 }
 0x378   :  { %v1195_v35 = vpop.f32.mrf.mxu0  ;;  %v1238_v36 = vpop.f32.mrf.mxu1 }
 0x379   :  { %v1237_v56 = vadd.f32 %v1236_v33, %v1194_v59  ;;  %v1196_v1 = vadd.f32 %v1195_v35, %v636_v38 }
 0x37a   :  { %v1197_v39 = vpop.f32.mrf.mxu0  ;;  %v1240_v40 = vpop.f32.mrf.mxu1 }
 0x37b   :  { %v1198_v57 = vadd.f32 %v1197_v39, %v640_v37  ;;  %v1325_v6 = vadd.f32 %v1237_v56, %v1235_v0  ;;  %v1239_v10 = vadd.f32 %v1238_v36, %v1196_v1 }
 0x37d   :  { %v1241_v7 = vadd.f32 %v1240_v40, %v1198_v57 }
 0x37f   :  { %v1329_v52 = vadd.f32 %v1241_v7, %v1239_v10 }
 0x394   :  { %v1614_v41 = vpop.f32.mrf.mxu0  ;;  %v1636_v50 = vpop.f32.mrf.mxu1 }
 0x396   :  { %v1615_v55 = vpop.f32.mrf.mxu0  ;;  %v1637_v58 = vpop.f32.mrf.mxu1 }
 0x397   :  { %v1616_v60 = vadd.f32 %v1615_v55, %v1614_v41  ;;  %v1638_v3 = vadd.f32 %v1637_v58, %v1636_v50  ;;  %v1378_v55 = vrot.slane %v1967_v47, %v1377_v63  ;;  %v1382_v58 = vrot.slane %v1969_v48, %v1377_v63 }
 0x398   :  { %v1617_v61 = vpop.f32.mrf.mxu0  ;;  %v1639_v62 = vpop.f32.mrf.mxu1 }
 0x399   :  { %v1278_v2 = vadd.f32 %v1616_v60, %v644_v53 }
 0x39a   :  { %v1618_v4 = vpop.f32.mrf.mxu0  ;;  %v1640_v5 = vpop.f32.mrf.mxu1 }
 0x39b   :  { %v1319_v8 = vadd.f32 %v1638_v3, %v1278_v2  ;;  %v1619_v9 = vadd.f32 %v1618_v4, %v1617_v61  ;;  %v1641_v42 = vadd.f32 %v1640_v5, %v1639_v62  ;;  %v1425_v3 = vsub.s32 7, %v1964_v45 }
 0x39d   :  { %v1281_v11 = vadd.f32 %v1619_v9, %v644_v53  ;;  %v1326_v12 = vadd.f32 %v1325_v6, %v1319_v8  ;;  %v1395_v53 = vsub.s32 5, %v1964_v45 }
 0x39f   :  { %v1322_v13 = vadd.f32 %v1641_v42, %v1281_v11  ;;  %1327 = vadd.xlane.f32.xlu1 %v1326_v12  ;;  %v1396_v60 = vrot.slane %v1967_v47, %v1395_v53  ;;  %v1400_v61 = vrot.slane %v1969_v48, %v1395_v53  ;;  %v1404_v2 = vrot.slane %v1971_v49, %v1395_v53 }
 0x3a0   :  { %v1426_v42 = vrot.slane %v1967_v47, %v1425_v3  ;;  %v1430_v12 = vrot.slane %v1969_v48, %v1425_v3 }
 0x3a1   :  { %v1330_v14 = vadd.f32 %v1329_v52, %v1322_v13 }
 0x3a3   :  { %1331 = vadd.xlane.f32.xlu1 %v1330_v14 }
 0x428   :  { %v1328_v15 = vpop.xlane.xlu1 %1327 }
 0x429   :  { %v1333_v16 = vmul.f32 0.0033333334, %v1328_v15 }
 0x42b   :  { %v1335_v17 = vsub.f32 %v1235_v0, %v1333_v16  ;;  %v1336_v18 = vsub.f32 %v1237_v56, %v1333_v16  ;;  %v1337_v19 = vsub.f32 %v1319_v8, %v1333_v16  ;;  %v1355_v46 = vmul.f32 %v1333_v16, %v1333_v16 }
 0x42c   :  { %v1332_v20 = vpop.xlane.xlu1 %1331  ;;  %v1386_v56 = vrot.slane %v1971_v49, %v1377_v63 }
 0x42d   :  { %v1334_v21 = vmul.f32 0.0033333334, %v1332_v20  ;;  %v1341_v22 = vmul.f32 %v1335_v17, %v1335_v17  ;;  %v1342_v23 = vmul.f32 %v1336_v18, %v1336_v18  ;;  %v1343_v24 = vmul.f32 %v1337_v19, %v1337_v19 }
 0x42e   :  { %v1357_v31 = vmul.f32 84.0, %v1355_v46 }
 0x42f   :  { %v1347_v25 = vadd.f32 %v1342_v23, %v1341_v22  ;;  %v1338_v26 = vsub.f32 %v1239_v10, %v1334_v21  ;;  %v1339_v27 = vsub.f32 %v1241_v7, %v1334_v21  ;;  %v1340_v28 = vsub.f32 %v1322_v13, %v1334_v21 }
 0x430   :  { %v1356_v32 = vmul.f32 %v1334_v21, %v1334_v21 }
 0x431   :  { %v1348_v54 = vadd.f32 %v1347_v25, %v1343_v24  ;;  %v1344_v29 = vmul.f32 %v1338_v26, %v1338_v26  ;;  %v1345_v44 = vmul.f32 %v1339_v27, %v1339_v27  ;;  %v1346_v30 = vmul.f32 %v1340_v28, %v1340_v28 }
 0x432   :  { %v1358_v36 = vmul.f32 84.0, %v1356_v32 }
 0x433   :  { %1349 = vadd.xlane.f32.xlu1 %v1348_v54  ;;  %v1351_v51 = vadd.f32 %v1345_v44, %v1344_v29 }
 0x435   :  { %v1352_v43 = vadd.f32 %v1351_v51, %v1346_v30 }
 0x437   :  { %1353 = vadd.xlane.f32.xlu1 %v1352_v43 }
 0x4bc   :  { %v1350_v33 = vpop.xlane.xlu1 %1349 }
 0x4bd   :  { %v1359_v34 = vsub.f32 %v1350_v33, %v1357_v31 }
 0x4bf   :  { %v1361_v35 = vmul.f32 0.0033333334, %v1359_v34 }
 0x4c0   :  { %v1354_v37 = vpop.xlane.xlu1 %1353 }
 0x4c1   :  { %v1363_v38 = vmax.f32 %v1361_v35, 0.0  ;;  %v1360_v39 = vsub.f32 %v1354_v37, %v1358_v36  ;;  %v1451_v36 = vsub.s32 6, %v1964_v45 }
 0x4c3   :  { %v1365_v40 = vadd.f32 1e-05, %v1363_v38  ;;  %v1362_v59 = vmul.f32 0.0033333334, %v1360_v39  ;;  %v1452_v37 = vrot.slane %v1967_v47, %v1451_v36 }
 0x4c5   :  { %1836 = vrsqrt.f32 %v1365_v40  ;;  %v1364_v41 = vmax.f32 %v1362_v59, 0.0 }
 0x4c7   :  { %v1366_v50 = vadd.f32 1e-05, %v1364_v41 }
 0x4c9   :  { %1838 = vrsqrt.f32 %v1366_v50 }
 0x4d2   :  { %v1837_v57 = vpop.eup %1836 }
 0x4d3   :  { %v1369_v62 = vmul.f32 %v1837_v57, %v1335_v17  ;;  %v1370_v0 = vmul.f32 %v1837_v57, %v1336_v18  ;;  %v1371_v1 = vmul.f32 %v1837_v57, %v1337_v19  ;;  %v1434_v18 = vrot.slane %v1971_v49, %v1425_v3 }
 0x4d5   :  { %v1387_v4 = vmul.f32 %v1378_v55, %v1369_v62  ;;  %v1388_v5 = vmul.f32 %v1382_v58, %v1370_v0  ;;  %v1389_v6 = vmul.f32 %v1386_v56, %v1371_v1 }
 0x4d6   :  { %v1839_v7 = vpop.eup %1838 }
 0x4d7   :  { %v1405_v8 = vadd.f32 %v1396_v60, %v1387_v4  ;;  %v1406_v9 = vadd.f32 %v1400_v61, %v1388_v5  ;;  %v1407_v10 = vadd.f32 %v1404_v2, %v1389_v6  ;;  %v1372_v11 = vmul.f32 %v1839_v7, %v1338_v26 }
 0x4d8   :  { %v1373_v52 = vmul.f32 %v1839_v7, %v1339_v27  ;;  %v1374_v13 = vmul.f32 %v1839_v7, %v1340_v28 }
 0x4d9   :  { %v1411_v14 = vmul.f32 0.01, %v1405_v8  ;;  %v1412_v15 = vmul.f32 0.01, %v1406_v9  ;;  %v1413_v16 = vmul.f32 0.01, %v1407_v10  ;;  %v1390_v17 = vmul.f32 %v1378_v55, %v1372_v11 }
 0x4da   :  { %v1391_v19 = vmul.f32 %v1382_v58, %v1373_v52  ;;  %v1392_v20 = vmul.f32 %v1386_v56, %v1374_v13 }
 0x4db   :  { %v1417_v21 = vmax.f32 %v1405_v8, %v1411_v14  ;;  %v1418_v22 = vmax.f32 %v1406_v9, %v1412_v15  ;;  %v1419_v23 = vmax.f32 %v1407_v10, %v1413_v16  ;;  %v1408_v24 = vadd.f32 %v1396_v60, %v1390_v17 }
 0x4dc   :  { %v1409_v25 = vadd.f32 %v1400_v61, %v1391_v19  ;;  %v1410_v26 = vadd.f32 %v1404_v2, %v1392_v20 }
 0x4dd   :  { %v1435_v54 = vmul.f32 %v1426_v42, %v1417_v21  ;;  %v1436_v29 = vmul.f32 %v1430_v12, %v1418_v22  ;;  %v1414_v44 = vmul.f32 0.01, %v1408_v24  ;;  %v1437_v28 = vmul.f32 %v1434_v18, %v1419_v23 }
 0x4de   :  { %v1415_v48 = vmul.f32 0.01, %v1409_v25  ;;  %v1416_v27 = vmul.f32 0.01, %v1410_v26 }
 0x4df   :  { %v1441_v30 = vadd.f32 %v1436_v29, %v1435_v54  ;;  %v1420_v51 = vmax.f32 %v1408_v24, %v1414_v44 }
 0x4e0   :  { %v1421_v43 = vmax.f32 %v1409_v25, %v1415_v48  ;;  %v1422_v46 = vmax.f32 %v1410_v26, %v1416_v27 }
 0x4e1   :  { %v1442_v31 = vadd.f32 %v1441_v30, %v1437_v28  ;;  %v1438_v49 = vmul.f32 %v1426_v42, %v1420_v51 }
 0x4e2   :  { %v1439_v32 = vmul.f32 %v1430_v12, %v1421_v43  ;;  %v1440_v33 = vmul.f32 %v1434_v18, %v1422_v46 }
 0x4e3   :  { %1443 = vadd.xlane.f32.xlu1 %v1442_v31 }
 0x4e4   :  { %v1445_v34 = vadd.f32 %v1439_v32, %v1438_v49 }
 0x4e6   :  { %v1446_v35 = vadd.f32 %v1445_v34, %v1440_v33 }
 0x4e8   :  { %1447 = vadd.xlane.f32.xlu1 %v1446_v35 }
 0x56c   :  { %v1444_v38 = vpop.xlane.xlu1 %1443 }
 0x56d   :  { %v1453_v39 = vadd.f32 %v1452_v37, %v1444_v38 }
 0x56f   :  { %1456 = vst.msk [vmem:[%s2114_s5] sm:$0xff] %vm1455_vm3, %v1453_v39 }
 0x571   :  { %v1448_v40 = vpop.xlane.xlu1 %1447 }
 0x572   :  { %v1454_v59 = vadd.f32 %v1452_v37, %v1448_v40 }
 0x574   :  { %1457 = vst.msk [vmem:[%s2114_s5 + $0x8] sm:$0xff] %vm1455_vm3, %v1454_v59 }
 0x575   :  { %1462 = vsyncpa [#allocation3], 1 }
 0x576   :  { %1463 = vsyncpa [#allocation5], 1 }

</bundles_post_ra>
